<compile_context>
chip_gen: v5e
topology: v5e:2x2
jax: 0.10.0
libtpu: 0.0.40
codegen_flags: <defaults>
</compile_context>

<pallas_src>
import numpy as np
import jax
import jax.numpy as jnp
from jax.experimental import pallas as pl
from jax.experimental.pallas import tpu as pltpu


_MAX_TILE = 2048          # rows per grid step (sublane-aligned, fits VMEM easily)
_VMEM_LIMIT = 32 << 20    # explicit scoped-VMEM budget (safe on v5e/v6e/v7x)


def _round_up(x, m):
    return -(-x // m) * m


def _table_spec(shape):
    """Grid-invariant table block: single-buffered if this JAX supports it."""
    try:
        return pl.BlockSpec(shape, lambda i: (0, 0),
                            pipeline_mode=pl.Buffered(1))
    except TypeError:  # older BlockSpec without pipeline_mode
        return pl.BlockSpec(shape, lambda i: (0, 0))


def _temporal_emb_kernel(idx_ref, tbl_ref, tod_out_ref, dow_out_ref):
    tm = idx_ref.shape[0]
    vocab = tbl_ref.shape[0]
    d = tod_out_ref.shape[1]

    packed = idx_ref[...]                      # [tm, 1] int32: hour | day_off<<16
    hours = packed & 0xFFFF                    # VPU unpack, no lane slicing
    days = packed >> 16                        # already offset by n_tod

    # Two-hot selection matrix built on the VPU (one iota, two compares, OR).
    lane = jax.lax.broadcasted_iota(jnp.int32, (tm, vocab), 1)
    hot = jnp.logical_or(hours == lane, days == lane).astype(jnp.float32)

    # Fused gather: [tm, V] x [V, 2d] on the MXU.  Block-diagonal table keeps
    # the two lookups independent; HIGHEST precision keeps the f32 table exact.
    res = jnp.dot(hot, tbl_ref[...],
                  preferred_element_type=jnp.float32,
                  precision=jax.lax.Precision.HIGHEST)

    tod_out_ref[...] = res[:, :d].astype(tod_out_ref.dtype)
    dow_out_ref[...] = res[:, d:].astype(dow_out_ref.dtype)


def get_temporal_emb(tod_table, dow_table, t_hour, t_day):
    """Pallas forward of get_TemporalEmb.

    Returns (tod_table[t_hour], dow_table[t_day]) with shape idx_shape + (d,).
    Dropout in the reference module is never applied in forward -> identity.
    """
    idx_shape = t_hour.shape
    assert t_day.shape == idx_shape
    d = tod_table.shape[1]
    assert dow_table.shape[1] == d
    n_tod = int(tod_table.shape[0])
    n_dow = int(dow_table.shape[0])
    assert n_tod + n_dow < 65536, "index packing uses 16-bit fields"

    out_dtype = tod_table.dtype
    M = int(np.prod(idx_shape))

    # ---- fused block-diagonal table: rows [tod; dow; zero-pad], cols [tod|dow]
    vocab = _round_up(n_tod + n_dow, 8)
    fused_tbl = jnp.zeros((vocab, 2 * d), out_dtype)
    fused_tbl = fused_tbl.at[:n_tod, :d].set(tod_table)
    fused_tbl = fused_tbl.at[n_tod:n_tod + n_dow, d:].set(dow_table)

    # ---- bit-pack indices: hour in low 16 bits, (day + n_tod) in high 16 bits
    hour = t_hour.reshape(M).astype(jnp.int32)
    day = t_day.reshape(M).astype(jnp.int32)
    packed = hour | ((day + n_tod) << 16)

    # ---- tiling: large sublane-aligned tiles; pad M up instead of shrinking tm
    tm = _MAX_TILE if M >= _MAX_TILE else max(8, _round_up(M, 8))
    m_pad = _round_up(M, tm)
    if m_pad != M:
        # padded rows select index 0 (valid); their outputs are sliced off below
        packed = jnp.concatenate(
            [packed, jnp.zeros((m_pad - M,), jnp.int32)], axis=0)
    packed = packed.reshape(m_pad, 1)
    grid = (m_pad // tm,)

    tod_flat, dow_flat = pl.pallas_call(
        _temporal_emb_kernel,
        out_shape=(jax.ShapeDtypeStruct((m_pad, d), out_dtype),
                   jax.ShapeDtypeStruct((m_pad, d), out_dtype)),
        grid=grid,
        in_specs=[
            pl.BlockSpec((tm, 1), lambda i: (i, 0)),      # packed indices
            _table_spec((vocab, 2 * d)),                  # fused table (full)
        ],
        out_specs=(pl.BlockSpec((tm, d), lambda i: (i, 0)),
                   pl.BlockSpec((tm, d), lambda i: (i, 0))),
        compiler_params=pltpu.CompilerParams(
            dimension_semantics=("arbitrary",),
            vmem_limit_bytes=_VMEM_LIMIT),
    )(packed, fused_tbl)

    return (tod_flat[:M].reshape(idx_shape + (d,)),
            dow_flat[:M].reshape(idx_shape + (d,)))


# --------------------------------------------------------------------------
if __name__ == "__main__":
    B, T = 2, 8
    d_model = 128
    slice_size_per_day = 24

    key = jax.random.PRNGKey(0)
    k_tod, k_dow, k_h, k_d = jax.random.split(key, 4)
    tod_table = jax.random.normal(k_tod, (slice_size_per_day, d_model),
                                  jnp.float32)
    dow_table = jax.random.normal(k_dow, (7, d_model), jnp.float32)
    t_hour = jax.random.randint(k_h, (B, T), 0, slice_size_per_day,
                                dtype=jnp.int32)
    t_day = jax.random.randint(k_d, (B, T), 0, 7, dtype=jnp.int32)

    fwd = jax.jit(get_temporal_emb)
    tod_emb, dow_emb = fwd(tod_table, dow_table, t_hour, t_day)
    jax.block_until_ready((tod_emb, dow_emb))

    assert tod_emb.shape == (B, T, d_model)
    assert dow_emb.shape == (B, T, d_model)

    # pure-JAX reference: nn.Embedding == row gather from the weight table.
    ref_tod = tod_table[t_hour]
    ref_dow = dow_table[t_day]
    np.testing.assert_allclose(np.asarray(tod_emb), np.asarray(ref_tod),
                               rtol=1e-6, atol=1e-6)
    np.testing.assert_allclose(np.asarray(dow_emb), np.asarray(ref_dow),
                               rtol=1e-6, atol=1e-6)

    print("KERNEL_OK")
</pallas_src>

<mosaic_0001>
module attributes {stable_mosaic.version = 11 : i64} {
  func.func @_temporal_emb_kernel(%arg0: i32, %arg1: memref<16x1xi32, #tpu.memory_space<vmem>>, %arg2: memref<32x256xf32, #tpu.memory_space<vmem>>, %arg3: memref<16x128xf32, #tpu.memory_space<vmem>>, %arg4: memref<16x128xf32, #tpu.memory_space<vmem>>) attributes {dimension_semantics = [#tpu.dimension_semantics<arbitrary>], iteration_bounds = array<i64: 1>, scalar_prefetch = 0 : i64, scratch_operands = 0 : i64, tpu.core_type = #tpu.core_type<tc>, window_params = [{transform_indices = @transform_0, window_bounds = array<i64: 16, 1>}, {pipeline_mode = #tpu.pipeline_mode<synchronous>, transform_indices = @transform_1, window_bounds = array<i64: 32, 256>}, {transform_indices = @transform_2, window_bounds = array<i64: 16, 128>}, {transform_indices = @transform_3, window_bounds = array<i64: 16, 128>}]} {
    %c0 = arith.constant 0 : index
    %c0_0 = arith.constant 0 : index
    %0 = vector.load %arg1[%c0, %c0_0] : memref<16x1xi32, #tpu.memory_space<vmem>>, vector<16x1xi32>
    %c65535_i32 = arith.constant 65535 : i32
    %1 = vector.broadcast %c65535_i32 : i32 to vector<16x1xi32>
    %2 = arith.andi %0, %1 : vector<16x1xi32>
    %c16_i32 = arith.constant 16 : i32
    %3 = vector.broadcast %c16_i32 : i32 to vector<16x1xi32>
    %4 = arith.shrsi %0, %3 : vector<16x1xi32>
    %5 = tpu.iota {dimensions = array<i32: 1>} : vector<16x32xi32>
    %6 = vector.broadcast %2 : vector<16x1xi32> to vector<16x32xi32>
    %7 = arith.cmpi eq, %6, %5 : vector<16x32xi32>
    %8 = vector.broadcast %4 : vector<16x1xi32> to vector<16x32xi32>
    %9 = arith.cmpi eq, %8, %5 : vector<16x32xi32>
    %10 = arith.ori %7, %9 : vector<16x32xi1>
    %11 = arith.extui %10 : vector<16x32xi1> to vector<16x32xi32>
    %12 = arith.sitofp %11 : vector<16x32xi32> to vector<16x32xf32>
    %c0_1 = arith.constant 0 : index
    %c0_2 = arith.constant 0 : index
    %13 = vector.load %arg2[%c0_1, %c0_2] : memref<32x256xf32, #tpu.memory_space<vmem>>, vector<32x256xf32>
    %cst = arith.constant dense<0.000000e+00> : vector<16x256xf32>
    %14 = tpu.matmul %12, %13, %cst {dimension_numbers = #tpu.dot_dimension_numbers<[1], [0], [0], [1], [0, 0, 1, 1], [], []>, precision = #tpu.contract_precision<fp32>} : vector<16x32xf32>, vector<32x256xf32>, vector<16x256xf32> -> vector<16x256xf32>
    %15 = vector.extract_strided_slice %14 {offsets = [0, 0], sizes = [16, 128], strides = [1, 1]} : vector<16x256xf32> to vector<16x128xf32>
    %c0_3 = arith.constant 0 : index
    %c0_4 = arith.constant 0 : index
    %16 = vector.load %arg3[%c0_3, %c0_4] : memref<16x128xf32, #tpu.memory_space<vmem>>, vector<16x128xf32>
    tpu.vector_store %arg3[%c0_3, %c0_4], %15 {strides = array<i32>} : memref<16x128xf32, #tpu.memory_space<vmem>>, vector<16x128xf32>,
    %17 = vector.extract_strided_slice %14 {offsets = [0, 128], sizes = [16, 128], strides = [1, 1]} : vector<16x256xf32> to vector<16x128xf32>
    %c0_5 = arith.constant 0 : index
    %c0_6 = arith.constant 0 : index
    %18 = vector.load %arg4[%c0_5, %c0_6] : memref<16x128xf32, #tpu.memory_space<vmem>>, vector<16x128xf32>
    tpu.vector_store %arg4[%c0_5, %c0_6], %17 {strides = array<i32>} : memref<16x128xf32, #tpu.memory_space<vmem>>, vector<16x128xf32>,
    return
  }
  func.func @transform_0(%arg0: i32) -> (i32, i32) {
    %c0_i32 = arith.constant 0 : i32
    %c0_i32_0 = arith.constant 0 : i32
    return %arg0, %c0_i32 : i32, i32
  }
  func.func @transform_1(%arg0: i32) -> (i32, i32) {
    %c0_i32 = arith.constant 0 : i32
    %c0_i32_0 = arith.constant 0 : i32
    %c0_i32_1 = arith.constant 0 : i32
    return %c0_i32, %c0_i32_0 : i32, i32
  }
  func.func @transform_2(%arg0: i32) -> (i32, i32) {
    %c0_i32 = arith.constant 0 : i32
    %c0_i32_0 = arith.constant 0 : i32
    return %arg0, %c0_i32 : i32, i32
  }
  func.func @transform_3(%arg0: i32) -> (i32, i32) {
    %c0_i32 = arith.constant 0 : i32
    %c0_i32_0 = arith.constant 0 : i32
    return %arg0, %c0_i32 : i32, i32
  }
}

</mosaic_0001>

<bundles_post_ra>
// kernel: get_temporal_emb.1
= control target key start
LH: loop header
LB: loop body
LE: loop exit
PB: predicated region body
PF: predicated region fallthrough
CT: control target
= control target key end

     0   :  { %9 = vsyncpa [#allocation3], 0  ;;  %s704_s0 = inlined_call_operand.vmem [shape: s32[16,1], index: 0, kind: input, shape index: {}]   ;;  %s705_s1 = inlined_call_operand.vmem [shape: f32[32,256], index: 1, kind: input, shape index: {}]   ;;  %s706_s2 = inlined_call_operand.hbm [shape: f32[16,128], index: 2, kind: output, shape index: {0}]   ;;  %s707_s3 = inlined_call_operand.hbm [shape: f32[16,128], index: 3, kind: output, shape index: {1}]  }
   0x1   :  { %v16_v0 = vld [vmem:[%s704_s0 + $0x8] sm:$0xff]  ;;  %v15_v1 = vld [vmem:[%s704_s0] sm:$0xff] }
   0x2   :  { %10 = vsyncpa [#allocation5], 0  ;;  %v606_v2 = vmov 0   ;;  %v18_v3 = vand.u32 65535, %v16_v0  ;;  %v17_v4 = vand.u32 65535, %v15_v1  ;;  %v20_v5 = vshra.s32 %v16_v0, 16 }
   0x3   :  { %553 = vset.pattern.permute.xlu1 %v606_v2  ;;  %552 = vset.pattern.permute.xlu0 %v606_v2  ;;  %v19_v6 = vshra.s32 %v15_v1, 16  ;;  %v51_v7 = vld [vmem:[%s705_s1 + $0x30] sm:$0xff]  ;;  %v49_v9 = vld [vmem:[%s705_s1 + $0x20] sm:$0xff]  ;;  %v52_v31 = vld [vmem:[%s705_s1 + $0x38] sm:$0xff]  ;;  %v21_v57 = vlaneseq  ;;  %vm53_vm5 = vcmask 261120   ;;  %v607_v61 = vmov 0.0  }
   0x4   :  { %27 = vperm.xlu1 %553, %v18_v3   ;;  %24 = vperm.xlu0 %552, %v17_v4   ;;  %v72_v8 = vand.u32 4294901760, %v51_v7  ;;  %v74_v11 = vand.u32 4294901760, %v49_v9  ;;  %v47_v14 = vld [vmem:[%s705_s1 + $0x10] sm:$0xff]  ;;  %v45_v18 = vld [vmem:[%s705_s1] sm:$0xff]  ;;  %v288_v32 = vand.u32 4294901760, %v52_v31  ;;  %v50_v33 = vld [vmem:[%s705_s1 + $0x28] sm:$0xff] }
   0x5   :  { %v76_v15 = vand.u32 4294901760, %v47_v14  ;;  %v78_v20 = vand.u32 4294901760, %v45_v18  ;;  %v658_v35 = vand.u32 4294901760, %v50_v33  ;;  %v48_v36 = vld [vmem:[%s705_s1 + $0x18] sm:$0xff]  ;;  %v46_v40 = vld [vmem:[%s705_s1 + $0x8] sm:$0xff]  ;;  %v22_v58 = vand.u32 127, %v21_v57 }
   0x6   :  { %v110_v10 = vsub.f32 %v51_v7, %v72_v8  ;;  %190 = vmatpush.msra.mxu3 %v72_v8  ;;  %73 = vmatpush.msra.mxu0 %v72_v8  ;;  %v116_v13 = vsub.f32 %v49_v9, %v74_v11  ;;  %v656_v34 = vsub.f32 %v52_v31, %v288_v32  ;;  %v292_v39 = vand.u32 4294901760, %v48_v36  ;;  %s608_s1 = smov [#allocation2]   ;;  %s502_s7 = sshll.u32 %s706_s2, 4  ;;  %s503_s7 = int_to_ptr.hbm [resolvable:$true] %s502_s7 }
   0x7   :  { %v122_v19 = vsub.f32 %v47_v14, %v76_v15  ;;  %v128_v24 = vsub.f32 %v45_v18, %v78_v20  ;;  %v666_v38 = vsub.f32 %v50_v33, %v658_v35  ;;  %v294_v44 = vand.u32 4294901760, %v46_v40  ;;  %s500_s4 = sshll.u32 %s608_s1, 4  ;;  %s609_s8 = smov 128   ;;  %s501_s4 = int_to_ptr.vmem [resolvable:$true] %s500_s4 }
   0x8   :  { %v111_v12 = vand.u32 4294901760, %v110_v10  ;;  %156 = vmatpush.msra.mxu2 %v110_v10  ;;  %192 = vmatpush.msra.mxu3 %v74_v11  ;;  %v117_v17 = vand.u32 4294901760, %v116_v13  ;;  %v327_v37 = vand.u32 4294901760, %v656_v34  ;;  %v338_v43 = vsub.f32 %v48_v36, %v292_v39  ;;  %s610_s9 = smov 8   ;;  %s611_s2 = smov [#allocation4]  }
   0x9   :  { %75 = vmatpush.msra.mxu0 %v74_v11  ;;  %v123_v23 = vand.u32 4294901760, %v122_v19  ;;  %v129_v27 = vand.u32 4294901760, %v128_v24  ;;  %v333_v42 = vand.u32 4294901760, %v666_v38  ;;  %v344_v48 = vsub.f32 %v46_v40, %v294_v44  ;;  %s513_s10 = sshll.u32 %s611_s2, 4  ;;  %s515_s13 = sshll.u32 %s707_s3, 4  ;;  %s514_s10 = int_to_ptr.vmem [resolvable:$true] %s513_s10  ;;  %s516_s13 = int_to_ptr.hbm [resolvable:$true] %s515_s13 }
   0xa   :  { %v112_v16 = vsub.f32 %v110_v10, %v111_v12  ;;  %159 = vmatpush.msra.mxu2 %v116_v13  ;;  %194 = vmatpush.msra.mxu3 %v76_v15  ;;  %v118_v22 = vsub.f32 %v116_v13, %v117_v17  ;;  %v328_v41 = vsub.f32 %v656_v34, %v327_v37  ;;  %v339_v47 = vand.u32 4294901760, %v338_v43 }
   0xb   :  { %77 = vmatpush.msra.mxu0 %v76_v15  ;;  %v124_v26 = vsub.f32 %v122_v19, %v123_v23  ;;  %v130_v29 = vsub.f32 %v128_v24, %v129_v27  ;;  %v334_v46 = vsub.f32 %v666_v38, %v333_v42  ;;  %v345_v51 = vand.u32 4294901760, %v344_v48 }
   0xc   :  { %35 = vperm.xlu1 %553, %v20_v5   ;;  %32 = vperm.xlu0 %552, %v19_v6   ;;  %v113_v21 = vand.u32 4294901760, %v112_v16  ;;  %v119_v25 = vand.u32 4294901760, %v118_v22  ;;  %v329_v45 = vand.u32 4294901760, %v328_v41  ;;  %v340_v50 = vsub.f32 %v338_v43, %v339_v47 }
   0xd   :  { %162 = vmatpush.msra.mxu2 %v122_v19  ;;  %196 = vmatpush.msra.mxu3 %v78_v20  ;;  %v125_v28 = vand.u32 4294901760, %v124_v26  ;;  %v131_v30 = vand.u32 4294901760, %v130_v29  ;;  %v335_v49 = vand.u32 4294901760, %v334_v46  ;;  %v346_v53 = vsub.f32 %v344_v48, %v345_v51 }
   0xe   :  { %114 = vmatpush.msra.mxu1 %v113_v21  ;;  %79 = vmatpush.msra.mxu0 %v78_v20  ;;  %v341_v52 = vand.u32 4294901760, %v340_v50 }
   0xf   :  { %165 = vmatpush.msra.mxu2 %v128_v24  ;;  %330 = vmatpush.msrb.mxu3 %v329_v45  ;;  %v347_v54 = vand.u32 4294901760, %v346_v53 }
  0x10   :  { %225 = vmatpush.msrb.mxu0 %v111_v12  ;;  %120 = vmatpush.msra.mxu1 %v119_v25 }
  0x11   :  { %289 = vmatpush.msrb.mxu2 %v288_v32  ;;  %336 = vmatpush.msrb.mxu3 %v335_v49 }
  0x12   :  { %229 = vmatpush.msrb.mxu0 %v117_v17  ;;  %126 = vmatpush.msra.mxu1 %v125_v28 }
  0x13   :  { %291 = vmatpush.msrb.mxu2 %v658_v35  ;;  %342 = vmatpush.msrb.mxu3 %v341_v52 }
  0x14   :  { %233 = vmatpush.msrb.mxu0 %v123_v23  ;;  %132 = vmatpush.msra.mxu1 %v131_v30 }
  0x15   :  { %293 = vmatpush.msrb.mxu2 %v292_v39  ;;  %348 = vmatpush.msrb.mxu3 %v347_v54 }
  0x16   :  { %237 = vmatpush.msrb.mxu0 %v129_v27  ;;  %260 = vmatpush.msrb.mxu1 %v72_v8 }
  0x17   :  { %295 = vmatpush.msrb.mxu2 %v294_v44 }
  0x18   :  { %262 = vmatpush.msrb.mxu1 %v74_v11 }
  0x1a   :  { %264 = vmatpush.msrb.mxu1 %v76_v15 }
  0x1c   :  { %266 = vmatpush.msrb.mxu1 %v78_v20 }
  0x76   :  { %v28_v55 = vpop.permute.xlu1 %27  ;;  %v25_v56 = vpop.permute.xlu0 %24 }
  0x77   :  { %vm30_vm0 = vcmp.eq.s32.totalorder %v28_v55, %v22_v58  ;;  %vm29_vm3 = vcmp.eq.s32.totalorder %v25_v56, %v22_v58 }
  0x7e   :  { %v36_v59 = vpop.permute.xlu1 %35  ;;  %v33_v60 = vpop.permute.xlu0 %32 }
  0x7f   :  { %vm38_vm1 = vcmp.eq.s32.totalorder %v36_v59, %v22_v58  ;;  %vm37_vm2 = vcmp.eq.s32.totalorder %v33_v60, %v22_v58 }
  0x80   :  { %vm40_vm4 = vmor %vm30_vm0, %vm38_vm1 }
  0x81   :  { %v533_v62 = vsel %vm40_vm4, 1.0, %v607_v61  ;;  %vm39_vm6 = vmor %vm29_vm3, %vm37_vm2 }
  0x82   :  { %v532_v63 = vsel %vm39_vm6, 1.0, %v607_v61  ;;  %v58_v1 = vsel %vm53_vm5, %v533_v62, 0 }
  0x83   :  { %534 = vmatmul.msk.f32.vlgmr.msra.gmra.mxu1 %vm53_vm5, %v532_v63  ;;  %v55_v0 = vsel %vm53_vm5, %v532_v63, 0  ;;  %v89_v4 = vsub.f32 %v58_v1, %v58_v1 }
  0x84   :  { %v81_v2 = vsub.f32 %v55_v0, %v55_v0  ;;  %406 = vmatpush.msra.mxu1 %v288_v32 }
  0x85   :  { %v90_v7 = vand.u32 4294901760, %v89_v4 }
  0x86   :  { %168 = vmatmul.f32.vlgmr.msra.gmra.mxu2 %v81_v2  ;;  %v82_v3 = vand.u32 4294901760, %v81_v2  ;;  %408 = vmatpush.msra.mxu1 %v658_v35 }
  0x87   :  { %441 = vmatpush.msra.mxu2 %v327_v37  ;;  %v91_v8 = vsub.f32 %v89_v4, %v90_v7 }
  0x88   :  { %200 = vmatmul.f32.vlgmr.msra.gmra.mxu3 %v82_v3  ;;  %v83_v5 = vsub.f32 %v81_v2, %v82_v3  ;;  %410 = vmatpush.msra.mxu1 %v292_v39 }
  0x89   :  { %476 = vmatpush.msra.mxu3 %v288_v32  ;;  %445 = vmatpush.msra.mxu2 %v333_v42  ;;  %v92_v9 = vand.u32 4294901760, %v91_v8 }
  0x8a   :  { %v84_v6 = vand.u32 4294901760, %v83_v5  ;;  %412 = vmatpush.msra.mxu1 %v294_v44 }
  0x8b   :  { %535 = vmatmul.msk.f32.gmra.mxu1 %vm53_vm5, %v533_v62  ;;  %478 = vmatpush.msra.mxu3 %v658_v35 }
  0x8c   :  { %85 = vmatmul.f32.vlgmr.msra.gmra.mxu0 %v84_v6  ;;  %449 = vmatpush.msra.mxu2 %v339_v47 }
  0x8d   :  { %372 = vmatpush.msra.mxu0 %v656_v34  ;;  %480 = vmatpush.msra.mxu3 %v292_v39 }
  0x8e   :  { %173 = vmatmul.f32.gmra.mxu2 %v89_v4 }
  0x8f   :  { %375 = vmatpush.msra.mxu0 %v666_v38  ;;  %453 = vmatpush.msra.mxu2 %v345_v51 }
  0x90   :  { %206 = vmatmul.f32.gmra.mxu3 %v90_v7 }
  0x91   :  { %378 = vmatpush.msra.mxu0 %v338_v43  ;;  %482 = vmatpush.msra.mxu3 %v294_v44 }
  0x93   :  { %538 = vmatmul.msk.f32.vlgmr.msrb.gmra.mxu1 %vm53_vm5, %v532_v63  ;;  %381 = vmatpush.msra.mxu0 %v344_v48 }
  0x94   :  { %93 = vmatmul.f32.gmra.mxu0 %v92_v9 }
  0x96   :  { %301 = vmatmul.f32.vlgmr.msrb.gmra.mxu2 %v84_v6 }
  0x98   :  { %540 = vmatmul.msk.f32.vlgmr.msrb.gmra.mxu3 %vm53_vm5, %v532_v63 }
  0x9b   :  { %539 = vmatmul.msk.f32.gmra.mxu1 %vm53_vm5, %v533_v62 }
  0x9c   :  { %536 = vmatmul.msk.f32.vlgmr.msrb.gmra.mxu0 %vm53_vm5, %v532_v63 }
  0x9e   :  { %309 = vmatmul.f32.gmra.mxu2 %v92_v9 }
  0xa0   :  { %541 = vmatmul.msk.f32.gmra.mxu3 %vm53_vm5, %v533_v62 }
  0xa3   :  { %416 = vmatmul.f32.vlgmr.msra.gmra.mxu1 %v82_v3 }
  0xa4   :  { %537 = vmatmul.msk.f32.gmra.mxu0 %vm53_vm5, %v533_v62 }
  0xa6   :  { %542 = vmatmul.msk.f32.vlgmr.msra.gmra.mxu2 %vm53_vm5, %v532_v63 }
  0xa8   :  { %544 = vmatmul.msk.f32.vlgmr.msra.gmra.mxu3 %vm53_vm5, %v532_v63 }
  0xab   :  { %422 = vmatmul.f32.gmra.mxu1 %v90_v7 }
  0xac   :  { %384 = vmatmul.f32.vlgmr.msra.gmra.mxu0 %v81_v2 }
  0xae   :  { %543 = vmatmul.msk.f32.gmra.mxu2 %vm53_vm5, %v533_v62 }
  0xb0   :  { %545 = vmatmul.msk.f32.gmra.mxu3 %vm53_vm5, %v533_v62 }
  0xb4   :  { %389 = vmatmul.f32.gmra.mxu0 %v89_v4 }
 0x100   :  { %v135_v10 = vpop.f32.mrf.mxu1 }
 0x108   :  { %v139_v13 = vpop.f32.mrf.mxu1 }
 0x109   :  { %v86_v11 = vpop.f32.mrf.mxu0  ;;  %v169_v12 = vpop.f32.mrf.mxu2 }
 0x10a   :  { %v136_v15 = vadd.f32 %v135_v10, %v86_v11 }
 0x10b   :  { %v201_v14 = vpop.f32.mrf.mxu3 }
 0x10c   :  { %v170_v19 = vadd.f32 %v169_v12, %v136_v15 }
 0x10e   :  { %v202_v21 = vadd.f32 %v201_v14, %v170_v19 }
 0x110   :  { %v269_v20 = vpop.f32.mrf.mxu1 }
 0x111   :  { %v94_v16 = vpop.f32.mrf.mxu0  ;;  %v174_v17 = vpop.f32.mrf.mxu2 }
 0x112   :  { %v140_v22 = vadd.f32 %v139_v13, %v94_v16 }
 0x113   :  { %v207_v18 = vpop.f32.mrf.mxu3 }
 0x114   :  { %v175_v27 = vadd.f32 %v174_v17, %v140_v22 }
 0x116   :  { %v208_v30 = vadd.f32 %v207_v18, %v175_v27 }
 0x118   :  { %v273_v29 = vpop.f32.mrf.mxu1 }
 0x119   :  { %v240_v23 = vpop.f32.mrf.mxu0  ;;  %v302_v24 = vpop.f32.mrf.mxu2 }
 0x11a   :  { %v241_v25 = vadd.f32 %v240_v23, %v202_v21 }
 0x11b   :  { %v351_v26 = vpop.f32.mrf.mxu3 }
 0x11c   :  { %v270_v28 = vadd.f32 %v269_v20, %v241_v25  ;;  %v352_v36 = vadd.f32 %v351_v26, %v302_v24 }
 0x11e   :  { %492 = vst [vmem:[#allocation2] sm:$0xff] %v270_v28 }
 0x120   :  { %v417_v37 = vpop.f32.mrf.mxu1 }
 0x121   :  { %v244_v31 = vpop.f32.mrf.mxu0  ;;  %v310_v32 = vpop.f32.mrf.mxu2 }
 0x122   :  { %v245_v33 = vadd.f32 %v244_v31, %v208_v30 }
 0x123   :  { %v355_v34 = vpop.f32.mrf.mxu3 }
 0x124   :  { %v274_v35 = vadd.f32 %v273_v29, %v245_v33  ;;  %v356_v44 = vadd.f32 %v355_v34, %v310_v32 }
 0x126   :  { %493 = vst [vmem:[#allocation2 + $0x8] sm:$0xff] %v274_v35 }
 0x127   :  { %508 = dma.vmem_to_hbm [thread:$0]  %s501_s4, 256, %s503_s7, [#allocation3], %s609_s8, %s609_s8, %s610_s9  }
 0x128   :  { %v423_v48 = vpop.f32.mrf.mxu1 }
 0x129   :  { %v385_v38 = vpop.f32.mrf.mxu0  ;;  %v456_v40 = vpop.f32.mrf.mxu2 }
 0x12a   :  { %v386_v39 = vadd.f32 %v385_v38, %v352_v36 }
 0x12b   :  { %v485_v42 = vpop.f32.mrf.mxu3 }
 0x12c   :  { %v418_v41 = vadd.f32 %v417_v37, %v386_v39 }
 0x12e   :  { %v457_v43 = vadd.f32 %v456_v40, %v418_v41 }
 0x130   :  { %v486_v45 = vadd.f32 %v485_v42, %v457_v43 }
 0x131   :  { %v390_v46 = vpop.f32.mrf.mxu0  ;;  %v460_v50 = vpop.f32.mrf.mxu2 }
 0x132   :  { %494 = vst [vmem:[#allocation4] sm:$0xff] %v486_v45  ;;  %v391_v47 = vadd.f32 %v390_v46, %v356_v44 }
 0x133   :  { %v489_v52 = vpop.f32.mrf.mxu3 }
 0x134   :  { %v424_v49 = vadd.f32 %v423_v48, %v391_v47 }
 0x136   :  { %v461_v51 = vadd.f32 %v460_v50, %v424_v49 }
 0x138   :  { %v490_v53 = vadd.f32 %v489_v52, %v461_v51 }
 0x13a   :  { %495 = vst [vmem:[#allocation4 + $0x8] sm:$0xff] %v490_v53 }
 0x13b   :  { %521 = dma.vmem_to_hbm [thread:$0]  %s514_s10, 256, %s516_s13, [#allocation5], %s609_s8, %s609_s8, %s610_s9  }
 0x13c   :  { %602 = dma.done.wait [#allocation3], 256  }
 0x13d   :  { %603 = vsyncadd [#allocation3], 4294967040 }
 0x13e   :  { %604 = dma.done.wait [#allocation5], 256  }
 0x13f   :  { %605 = vsyncadd [#allocation5], 4294967040 }
 0x140   :  { %530 = vsyncpa [#allocation3], 1 }
 0x141   :  { %531 = vsyncpa [#allocation5], 1 }

</bundles_post_ra>
